<compile_context>
chip_gen: v6e
topology: v6e:2x2x1
jax: 0.10.0
libtpu: 0.0.40
codegen_flags: <defaults>
</compile_context>

<pallas_src>
import jax
import jax.numpy as jnp
from jax.experimental import pallas as pl
from jax.experimental.pallas import tpu as pltpu


LANES = 128      # vreg lane width: feature dims padded to this (lane-dense stores)
SUBLANES = 8     # f32 sublane count: batch dim padded to a multiple of this


def _ceil_to(x, m):
    return ((x + m - 1) // m) * m


def _pad_to(a, shape):
    return jnp.pad(a, [(0, s - d) for d, s in zip(a.shape, shape)])


# ----------------------------------------------------------------------------
# Fused full-network kernel (normalize + all Linear layers + tanh)
# ----------------------------------------------------------------------------
def _pinn_mlp_kernel(x_ref, scale_ref, shift_ref, w_ref, b_ref, o_ref):
    # Input normalization 2*(x-lb)/(ub-lb) - 1 rewritten as x*scale + shift
    # (scale/shift are zero in padded lanes, so padded lanes stay exactly 0).
    h = x_ref[...] * scale_ref[...] + shift_ref[...]
    n_layers = w_ref.shape[0]
    # Hidden layers: MXU matmul (f32 accumulate) + bias + tanh (EUP).
    # Static Python loop: traced once, n_layers is small and fixed.
    for l in range(n_layers - 1):
        h = jnp.tanh(
            jnp.dot(h, w_ref[l], preferred_element_type=jnp.float32) + b_ref[l]
        )
    # Output layer: no activation.
    o_ref[...] = (
        jnp.dot(h, w_ref[n_layers - 1], preferred_element_type=jnp.float32)
        + b_ref[n_layers - 1]
    ).astype(o_ref.dtype)


def pinn_net_forward(x, weights, biases, lb, ub):
    """Fused forward of the whole PINN Net in one pallas_call.

    x: [N, D_in]; weights[i]: [d_i, d_{i+1}]; biases[i]: [1, d_{i+1}].
    tanh on all layers but the last. Returns [N, d_out].
    """
    n, d_in = x.shape
    d_out = weights[-1].shape[1]
    n_layers = len(weights)
    p = LANES
    assert d_in <= p and all(w.shape[0] <= p and w.shape[1] <= p for w in weights)

    n_rows = max(_ceil_to(n, SUBLANES), SUBLANES)

    # Per-feature affine coefficients; zero in padded lanes so no inf/nan
    # from (ub - lb) in lanes that do not exist.
    lb_a = jnp.broadcast_to(jnp.asarray(lb, jnp.float32), (d_in,))
    ub_a = jnp.broadcast_to(jnp.asarray(ub, jnp.float32), (d_in,))
    scale = 2.0 / (ub_a - lb_a)
    shift = -2.0 * lb_a / (ub_a - lb_a) - 1.0

    x_p = _pad_to(x.astype(jnp.float32), (n_rows, p))
    scale_p = _pad_to(scale.reshape(1, d_in), (1, p))
    shift_p = _pad_to(shift.reshape(1, d_in), (1, p))
    w_p = jnp.stack([_pad_to(w.astype(jnp.float32), (p, p)) for w in weights])
    b_p = jnp.stack([_pad_to(b.astype(jnp.float32), (1, p)) for b in biases])

    cost = pl.CostEstimate(
        flops=2 * n_rows * p * p * n_layers,
        transcendentals=n_rows * p * (n_layers - 1),
        bytes_accessed=4 * (x_p.size + w_p.size + b_p.size + 2 * p + n_rows * p),
    )

    out = pl.pallas_call(
        _pinn_mlp_kernel,
        out_shape=jax.ShapeDtypeStruct((n_rows, p), jnp.float32),
        in_specs=[
            pl.BlockSpec((n_rows, p), lambda: (0, 0)),
            pl.BlockSpec((1, p), lambda: (0, 0)),
            pl.BlockSpec((1, p), lambda: (0, 0)),
            pl.BlockSpec((n_layers, p, p), lambda: (0, 0, 0)),
            pl.BlockSpec((n_layers, 1, p), lambda: (0, 0, 0)),
        ],
        out_specs=pl.BlockSpec((n_rows, p), lambda: (0, 0)),
        compiler_params=pltpu.CompilerParams(vmem_limit_bytes=32 * 1024 * 1024),
        cost_estimate=cost,
    )(x_p, scale_p, shift_p, w_p, b_p)
    return out[:n, :d_out]


# ----------------------------------------------------------------------------
# General tiled Linear: y = x @ w + b
# ----------------------------------------------------------------------------
def _linear_tiled_kernel(x_ref, w_ref, b_ref, o_ref, acc_ref):
    k = pl.program_id(2)

    @pl.when(k == 0)
    def _():
        acc_ref[...] = jnp.zeros_like(acc_ref)

    # Hot K-loop: pure MXU + f32 accumulate.
    acc_ref[...] += jnp.dot(x_ref[...], w_ref[...],
                            preferred_element_type=jnp.float32)

    @pl.when(k == pl.num_programs(2) - 1)
    def _():
        # Bias applied once, in the epilogue only (b is already f32).
        o_ref[...] = (acc_ref[...] + b_ref[...]).astype(o_ref.dtype)


def linear_forward(x, w, b, *, tm=128, tn=128, tk=128):
    """y = x @ w + b as a tiled, pipelined Pallas kernel.

    Pads all dims up to the tile grid (zero padding keeps the math exact) and
    crops the result; output tiles are lane-dense (tn multiple of 128).
    """
    n, k_dim = x.shape
    k_dim_w, m_out = w.shape
    assert k_dim == k_dim_w
    assert b.shape == (1, m_out)

    mp = _ceil_to(n, tm)
    kp = _ceil_to(k_dim, tk)
    np_ = _ceil_to(m_out, tn)

    x_p = _pad_to(x.astype(jnp.float32), (mp, kp))
    w_p = _pad_to(w.astype(jnp.float32), (kp, np_))
    b_p = _pad_to(b.astype(jnp.float32), (1, np_))

    grid = (mp // tm, np_ // tn, kp // tk)   # reduction axis (K) last
    itemsize = jnp.dtype(jnp.float32).itemsize
    cost = pl.CostEstimate(
        flops=2 * mp * np_ * kp,
        transcendentals=0,
        bytes_accessed=itemsize * (x_p.size + w_p.size + b_p.size + mp * np_),
    )

    out = pl.pallas_call(
        _linear_tiled_kernel,
        out_shape=jax.ShapeDtypeStruct((mp, np_), jnp.float32),
        grid_spec=pltpu.PrefetchScalarGridSpec(
            num_scalar_prefetch=0,
            grid=grid,
            in_specs=[
                pl.BlockSpec((tm, tk), lambda i, j, kk: (i, kk)),
                pl.BlockSpec((tk, tn), lambda i, j, kk: (kk, j)),
                pl.BlockSpec((1, tn), lambda i, j, kk: (0, j)),
            ],
            out_specs=pl.BlockSpec((tm, tn), lambda i, j, kk: (i, j)),
            scratch_shapes=[pltpu.VMEM((tm, tn), jnp.float32)],
        ),
        compiler_params=pltpu.CompilerParams(
            dimension_semantics=("parallel", "parallel", "arbitrary"),
            vmem_limit_bytes=32 * 1024 * 1024,
        ),
        cost_estimate=cost,
    )(x_p, w_p, b_p)
    return out[:n, :m_out].astype(x.dtype)


# ----------------------------------------------------------------------------
# Parameter init + pure-JAX reference
# ----------------------------------------------------------------------------
def xavier_normal(key, d_in, d_out, dtype=jnp.float32):
    # torch.nn.init.xavier_normal_ (gain=1): std = sqrt(2/(fan_in+fan_out))
    std = jnp.sqrt(2.0 / (d_in + d_out)).astype(dtype)
    return jax.random.normal(key, (d_in, d_out), dtype=dtype) * std


def _net_reference(x, weights, biases, lb, ub):
    d_in = x.shape[1]
    lb_a = jnp.broadcast_to(jnp.asarray(lb, jnp.float32), (d_in,))
    ub_a = jnp.broadcast_to(jnp.asarray(ub, jnp.float32), (d_in,))
    h = 2.0 * (x - lb_a) / (ub_a - lb_a) - 1.0
    for w_, b_ in zip(weights[:-1], biases[:-1]):
        h = jnp.tanh(h @ w_ + b_)
    return h @ weights[-1] + biases[-1]


if __name__ == "__main__":
    key = jax.random.PRNGKey(0)

    # Shapes implied by the spec: x = torch.rand(10, 2); Net(2, 2, 4, [-1], [1])
    N, D_IN, WIDTH, LENGTH = 10, 2, 2, 4
    LB, UB = [-1.0], [1.0]

    dims = [(D_IN, WIDTH)] + [(WIDTH, WIDTH)] * LENGTH + [(WIDTH, 1)]
    keys = jax.random.split(key, len(dims) + 2)
    x = jax.random.uniform(keys[0], (N, D_IN), dtype=jnp.float32)
    weights = [xavier_normal(k, di, do) for k, (di, do) in zip(keys[1:], dims)]
    biases = [jnp.zeros((1, do), jnp.float32) for (_, do) in dims]

    # --- fused full-network forward (primary path) ---
    y = jax.block_until_ready(pinn_net_forward(x, weights, biases, LB, UB))
    y_ref = _net_reference(x, weights, biases, LB, UB)
    assert y.shape == (N, 1)
    assert jnp.allclose(y, y_ref, atol=1e-5, rtol=1e-5)

    # --- standalone tiled Linear, module-sized ---
    y_lin = jax.block_until_ready(linear_forward(x, weights[0], biases[0]))
    assert jnp.allclose(y_lin, x @ weights[0] + biases[0], atol=1e-5, rtol=1e-5)

    # --- standalone tiled Linear, multi-tile grid (exercises accumulator /
    #     epilogue).  Integer-valued inputs make the check exact regardless of
    #     MXU precision mode. ---
    km, kw, kb = jax.random.split(keys[-1], 3)
    M2, K2, N2 = 256, 384, 256
    x2 = jax.random.randint(km, (M2, K2), -2, 3).astype(jnp.float32)
    w2 = jax.random.randint(kw, (K2, N2), -2, 3).astype(jnp.float32)
    b2 = jax.random.randint(kb, (1, N2), -2, 3).astype(jnp.float32)
    y2 = jax.block_until_ready(linear_forward(x2, w2, b2))
    assert jnp.allclose(y2, x2 @ w2 + b2, atol=1e-5, rtol=1e-5)

    # TODO(synk): backward pass (requires_grad in the spec) is not implemented;
    # only the forward semantics are covered.
    print("KERNEL_OK")
</pallas_src>

<mosaic_0001>
module attributes {stable_mosaic.version = 11 : i64} {
  func.func @_pinn_mlp_kernel(%arg0: memref<16x128xf32, #tpu.memory_space<vmem>>, %arg1: memref<1x128xf32, #tpu.memory_space<vmem>>, %arg2: memref<1x128xf32, #tpu.memory_space<vmem>>, %arg3: memref<6x128x128xf32, #tpu.memory_space<vmem>>, %arg4: memref<6x1x128xf32, #tpu.memory_space<vmem>>, %arg5: memref<16x128xf32, #tpu.memory_space<vmem>>) attributes {dimension_semantics = [], scalar_prefetch = 0 : i64, scratch_operands = 0 : i64, tpu.core_type = #tpu.core_type<tc>} {
    %c0 = arith.constant 0 : index
    %c0_0 = arith.constant 0 : index
    %0 = vector.load %arg0[%c0, %c0_0] : memref<16x128xf32, #tpu.memory_space<vmem>>, vector<16x128xf32>
    %c0_1 = arith.constant 0 : index
    %c0_2 = arith.constant 0 : index
    %1 = vector.load %arg1[%c0_1, %c0_2] : memref<1x128xf32, #tpu.memory_space<vmem>>, vector<1x128xf32>
    %2 = vector.broadcast %1 : vector<1x128xf32> to vector<16x128xf32>
    %3 = arith.mulf %0, %2 : vector<16x128xf32>
    %c0_3 = arith.constant 0 : index
    %c0_4 = arith.constant 0 : index
    %4 = vector.load %arg2[%c0_3, %c0_4] : memref<1x128xf32, #tpu.memory_space<vmem>>, vector<1x128xf32>
    %5 = vector.broadcast %4 : vector<1x128xf32> to vector<16x128xf32>
    %6 = arith.addf %3, %5 : vector<16x128xf32>
    %c0_5 = arith.constant 0 : index
    %c0_6 = arith.constant 0 : index
    %c0_7 = arith.constant 0 : index
    %7 = vector.load %arg3[%c0_5, %c0_6, %c0_7] : memref<6x128x128xf32, #tpu.memory_space<vmem>>, vector<1x128x128xf32>
    %8 = vector.shape_cast %7 : vector<1x128x128xf32> to vector<128x128xf32>
    %cst = arith.constant dense<0.000000e+00> : vector<16x128xf32>
    %9 = tpu.matmul %6, %8, %cst {dimension_numbers = #tpu.dot_dimension_numbers<[1], [0], [0], [1], [0, 0, 1, 1], [], []>} : vector<16x128xf32>, vector<128x128xf32>, vector<16x128xf32> -> vector<16x128xf32>
    %c0_8 = arith.constant 0 : index
    %c0_9 = arith.constant 0 : index
    %c0_10 = arith.constant 0 : index
    %10 = vector.load %arg4[%c0_8, %c0_9, %c0_10] : memref<6x1x128xf32, #tpu.memory_space<vmem>>, vector<1x1x128xf32>
    %11 = vector.shape_cast %10 : vector<1x1x128xf32> to vector<1x128xf32>
    %12 = vector.broadcast %11 : vector<1x128xf32> to vector<16x128xf32>
    %13 = arith.addf %9, %12 : vector<16x128xf32>
    %14 = math.tanh %13 : vector<16x128xf32>
    %c1 = arith.constant 1 : index
    %c0_11 = arith.constant 0 : index
    %c0_12 = arith.constant 0 : index
    %15 = vector.load %arg3[%c1, %c0_11, %c0_12] : memref<6x128x128xf32, #tpu.memory_space<vmem>>, vector<1x128x128xf32>
    %16 = vector.shape_cast %15 : vector<1x128x128xf32> to vector<128x128xf32>
    %cst_13 = arith.constant dense<0.000000e+00> : vector<16x128xf32>
    %17 = tpu.matmul %14, %16, %cst_13 {dimension_numbers = #tpu.dot_dimension_numbers<[1], [0], [0], [1], [0, 0, 1, 1], [], []>} : vector<16x128xf32>, vector<128x128xf32>, vector<16x128xf32> -> vector<16x128xf32>
    %c1_14 = arith.constant 1 : index
    %c0_15 = arith.constant 0 : index
    %c0_16 = arith.constant 0 : index
    %18 = vector.load %arg4[%c1_14, %c0_15, %c0_16] : memref<6x1x128xf32, #tpu.memory_space<vmem>>, vector<1x1x128xf32>
    %19 = vector.shape_cast %18 : vector<1x1x128xf32> to vector<1x128xf32>
    %20 = vector.broadcast %19 : vector<1x128xf32> to vector<16x128xf32>
    %21 = arith.addf %17, %20 : vector<16x128xf32>
    %22 = math.tanh %21 : vector<16x128xf32>
    %c2 = arith.constant 2 : index
    %c0_17 = arith.constant 0 : index
    %c0_18 = arith.constant 0 : index
    %23 = vector.load %arg3[%c2, %c0_17, %c0_18] : memref<6x128x128xf32, #tpu.memory_space<vmem>>, vector<1x128x128xf32>
    %24 = vector.shape_cast %23 : vector<1x128x128xf32> to vector<128x128xf32>
    %cst_19 = arith.constant dense<0.000000e+00> : vector<16x128xf32>
    %25 = tpu.matmul %22, %24, %cst_19 {dimension_numbers = #tpu.dot_dimension_numbers<[1], [0], [0], [1], [0, 0, 1, 1], [], []>} : vector<16x128xf32>, vector<128x128xf32>, vector<16x128xf32> -> vector<16x128xf32>
    %c2_20 = arith.constant 2 : index
    %c0_21 = arith.constant 0 : index
    %c0_22 = arith.constant 0 : index
    %26 = vector.load %arg4[%c2_20, %c0_21, %c0_22] : memref<6x1x128xf32, #tpu.memory_space<vmem>>, vector<1x1x128xf32>
    %27 = vector.shape_cast %26 : vector<1x1x128xf32> to vector<1x128xf32>
    %28 = vector.broadcast %27 : vector<1x128xf32> to vector<16x128xf32>
    %29 = arith.addf %25, %28 : vector<16x128xf32>
    %30 = math.tanh %29 : vector<16x128xf32>
    %c3 = arith.constant 3 : index
    %c0_23 = arith.constant 0 : index
    %c0_24 = arith.constant 0 : index
    %31 = vector.load %arg3[%c3, %c0_23, %c0_24] : memref<6x128x128xf32, #tpu.memory_space<vmem>>, vector<1x128x128xf32>
    %32 = vector.shape_cast %31 : vector<1x128x128xf32> to vector<128x128xf32>
    %cst_25 = arith.constant dense<0.000000e+00> : vector<16x128xf32>
    %33 = tpu.matmul %30, %32, %cst_25 {dimension_numbers = #tpu.dot_dimension_numbers<[1], [0], [0], [1], [0, 0, 1, 1], [], []>} : vector<16x128xf32>, vector<128x128xf32>, vector<16x128xf32> -> vector<16x128xf32>
    %c3_26 = arith.constant 3 : index
    %c0_27 = arith.constant 0 : index
    %c0_28 = arith.constant 0 : index
    %34 = vector.load %arg4[%c3_26, %c0_27, %c0_28] : memref<6x1x128xf32, #tpu.memory_space<vmem>>, vector<1x1x128xf32>
    %35 = vector.shape_cast %34 : vector<1x1x128xf32> to vector<1x128xf32>
    %36 = vector.broadcast %35 : vector<1x128xf32> to vector<16x128xf32>
    %37 = arith.addf %33, %36 : vector<16x128xf32>
    %38 = math.tanh %37 : vector<16x128xf32>
    %c4 = arith.constant 4 : index
    %c0_29 = arith.constant 0 : index
    %c0_30 = arith.constant 0 : index
    %39 = vector.load %arg3[%c4, %c0_29, %c0_30] : memref<6x128x128xf32, #tpu.memory_space<vmem>>, vector<1x128x128xf32>
    %40 = vector.shape_cast %39 : vector<1x128x128xf32> to vector<128x128xf32>
    %cst_31 = arith.constant dense<0.000000e+00> : vector<16x128xf32>
    %41 = tpu.matmul %38, %40, %cst_31 {dimension_numbers = #tpu.dot_dimension_numbers<[1], [0], [0], [1], [0, 0, 1, 1], [], []>} : vector<16x128xf32>, vector<128x128xf32>, vector<16x128xf32> -> vector<16x128xf32>
    %c4_32 = arith.constant 4 : index
    %c0_33 = arith.constant 0 : index
    %c0_34 = arith.constant 0 : index
    %42 = vector.load %arg4[%c4_32, %c0_33, %c0_34] : memref<6x1x128xf32, #tpu.memory_space<vmem>>, vector<1x1x128xf32>
    %43 = vector.shape_cast %42 : vector<1x1x128xf32> to vector<1x128xf32>
    %44 = vector.broadcast %43 : vector<1x128xf32> to vector<16x128xf32>
    %45 = arith.addf %41, %44 : vector<16x128xf32>
    %46 = math.tanh %45 : vector<16x128xf32>
    %c5 = arith.constant 5 : index
    %c0_35 = arith.constant 0 : index
    %c0_36 = arith.constant 0 : index
    %47 = vector.load %arg3[%c5, %c0_35, %c0_36] : memref<6x128x128xf32, #tpu.memory_space<vmem>>, vector<1x128x128xf32>
    %48 = vector.shape_cast %47 : vector<1x128x128xf32> to vector<128x128xf32>
    %cst_37 = arith.constant dense<0.000000e+00> : vector<16x128xf32>
    %49 = tpu.matmul %46, %48, %cst_37 {dimension_numbers = #tpu.dot_dimension_numbers<[1], [0], [0], [1], [0, 0, 1, 1], [], []>} : vector<16x128xf32>, vector<128x128xf32>, vector<16x128xf32> -> vector<16x128xf32>
    %c5_38 = arith.constant 5 : index
    %c0_39 = arith.constant 0 : index
    %c0_40 = arith.constant 0 : index
    %50 = vector.load %arg4[%c5_38, %c0_39, %c0_40] : memref<6x1x128xf32, #tpu.memory_space<vmem>>, vector<1x1x128xf32>
    %51 = vector.shape_cast %50 : vector<1x1x128xf32> to vector<1x128xf32>
    %52 = vector.broadcast %51 : vector<1x128xf32> to vector<16x128xf32>
    %53 = arith.addf %49, %52 : vector<16x128xf32>
    %c0_41 = arith.constant 0 : index
    %c0_42 = arith.constant 0 : index
    %54 = vector.load %arg5[%c0_41, %c0_42] : memref<16x128xf32, #tpu.memory_space<vmem>>, vector<16x128xf32>
    tpu.vector_store %arg5[%c0_41, %c0_42], %53 {strides = array<i32>} : memref<16x128xf32, #tpu.memory_space<vmem>>, vector<16x128xf32>,
    return
  }
}

</mosaic_0001>

<bundles_post_ra>
// kernel: tpu_custom_call.1
= control target key start
LH: loop header
LB: loop body
LE: loop exit
PB: predicated region body
PF: predicated region fallthrough
CT: control target
= control target key end

     0   :  { %10 = vsyncpa [#allocation3], 0  ;;  %s1229_s0 = inlined_call_operand.hbm [shape: f32[16,128], index: 0, kind: input, shape index: {}]   ;;  %s1230_s1 = inlined_call_operand.vmem [shape: f32[1,128], index: 1, kind: input, shape index: {}]   ;;  %s1231_s2 = inlined_call_operand.hbm [shape: f32[1,128], index: 2, kind: input, shape index: {}]   ;;  %s1232_s3 = inlined_call_operand.hbm [shape: f32[6,128,128], index: 3, kind: input, shape index: {}]   ;;  %s1233_s4 = inlined_call_operand.vmem [shape: f32[6,1,128], index: 4, kind: input, shape index: {}]   ;;  %s1234_s5 = inlined_call_operand.hbm [shape: f32[16,128], index: 5, kind: output, shape index: {}]  }
   0x1   :  { %11 = vsyncpa [#allocation6], 0 }
   0x2   :  { %12 = vsyncpa [#allocation4], 0  ;;  %s1151_s18 = smov [#allocation5]   ;;  %s1152_s20 = smov [#allocation2]  }
   0x3   :  { %s33_s19 = sshll.u32 %s1151_s18, 4  ;;  %s18_s21 = sshll.u32 %s1152_s20, 4  ;;  %s34_s19 = int_to_ptr.vmem [resolvable:$true] %s33_s19  ;;  %s19_s21 = int_to_ptr.vmem [resolvable:$true] %s18_s21 }
   0x4   :  { %s1073_s22 = scalar_lea.vmem %s34_s19, 16  ;;  %s1077_s23 = scalar_lea.vmem %s34_s19, 32 }
   0x5   :  { %p1074_p0 = scmp.ne.s32.totalorder %s34_s19, %s1073_s22  ;;  %p1078_p1 = scmp.lt.s32.totalorder %s34_s19, %s34_s19 }
   0x6   :  { %p1079_p2 = scmp.lt.s32.totalorder %s1077_s23, %s1073_s22 }
   0x8   :  { %p1080_p3 = por %p1079_p2, %p1078_p1 }
   0xa   :  { %p1081_p4 = pnand %p1080_p3, %p1074_p0 }
   0xc   :  { %1084 = shalt.err (!%p1081_p4)
}
   0xd   :  { %36 = dma.hbm_to_vmem [thread:$0]  %s1231_s2, 16, %s34_s19, [#allocation6]  }
   0xe   :  { %s1093_s26 = scalar_lea.vmem %s19_s21, 256  ;;  %p1098_p6 = scmp.lt.s32.totalorder %s19_s21, %s19_s21 }
   0xf   :  { %p1094_p5 = scmp.ne.s32.totalorder %s19_s21, %s1093_s26  ;;  %p1099_p7 = scmp.lt.s32.totalorder %s1093_s26, %s1093_s26 }
  0x11   :  { %p1100_p8 = por %p1099_p7, %p1098_p6 }
  0x13   :  { %p1101_p9 = pnand %p1100_p8, %p1094_p5 }
  0x15   :  { %1104 = shalt.err (!%p1101_p9)
}
  0x16   :  { %s1153_s27 = smov 128   ;;  %s1154_s28 = smov 8  }
  0x17   :  { %24 = dma.hbm_to_vmem [thread:$0]  %s1229_s0, 256, %s19_s21, [#allocation3], %s1153_s27, %s1153_s27, %s1154_s28  }
  0x18   :  { %s1155_s6 = smov [#allocation7]  }
  0x19   :  { %s42_s7 = sshll.u32 %s1155_s6, 4  ;;  %s43_s7 = int_to_ptr.vmem [resolvable:$true] %s42_s7 }
  0x1a   :  { %s1113_s2 = scalar_lea.vmem %s43_s7, 12288  ;;  %p1118_p11 = scmp.lt.s32.totalorder %s43_s7, %s43_s7 }
  0x1b   :  { %p1114_p10 = scmp.ne.s32.totalorder %s43_s7, %s1113_s2  ;;  %p1119_p12 = scmp.lt.s32.totalorder %s1113_s2, %s1113_s2 }
  0x1d   :  { %p1120_p13 = por %p1119_p12, %p1118_p11 }
  0x1f   :  { %p1121_p0 = pnand %p1120_p13, %p1114_p10 }
  0x21   :  { %1124 = shalt.err (!%p1121_p0)
}
  0x22   :  { %48 = dma.hbm_to_vmem [thread:$0]  %s1232_s3, 12288, %s43_s7, [#allocation6], %s1153_s27, %s1153_s27, %s1154_s28  }
  0x23   :  { %1145 = dma.done.wait [#allocation3], 256  }
  0x24   :  { %1146 = vsyncadd [#allocation3], 4294967040 }
  0x25   :  { %1147 = dma.done.wait [#allocation6], 12304  }
  0x26   :  { %1148 = vsyncadd [#allocation6], 4294954992  ;;  %v95_v0 = vld [vmem:[#allocation7 + $0x78] sm:$0xff]  ;;  %v94_v1 = vld [vmem:[#allocation7 + $0x70] sm:$0xff]  ;;  %s1156_s21 = smov [#allocation8]  }
  0x27   :  { %829 = vmatprep.subr.mxu0 %v95_v0  ;;  %v93_v2 = vld [vmem:[#allocation7 + $0x68] sm:$0xff]  ;;  %v92_v3 = vld [vmem:[#allocation7 + $0x60] sm:$0xff]  ;;  %v91_v4 = vld [vmem:[#allocation7 + $0x58] sm:$0xff]  ;;  %s695_s22 = sshll.u32 %s1156_s21, 4  ;;  %s696_s22 = int_to_ptr.vmem [resolvable:$true] %s695_s22 }
  0x28   :  { %830 = vmatpush3.msra.mxu0 %v95_v0  ;;  %v60_v5 = vld [vmem:[#allocation2] sm:$0xff]  ;;  %v709_v7 = vld [vmem:[#allocation5] ss:$0 sm:$0xff]  ;;  %v193_v15 = vld [vmem:[#allocation7 + $0xe0] sm:$0xff]  ;;  %s1125_s23 = scalar_lea.vmem %s696_s22, 256  ;;  %p1130_p2 = scmp.lt.s32.totalorder %s696_s22, %s696_s22 }
  0x29   :  { %831 = vmatprep.subr.mxu0 %v94_v1  ;;  %v708_v6 = vld [vmem:[%s1230_s1] ss:$0 sm:$0xff]  ;;  %v196_v8 = vld [vmem:[#allocation7 + $0xf8] sm:$0xff]  ;;  %v195_v10 = vld [vmem:[#allocation7 + $0xf0] sm:$0xff]  ;;  %p1126_p1 = scmp.ne.s32.totalorder %s696_s22, %s1125_s23  ;;  %p1131_p3 = scmp.lt.s32.totalorder %s1125_s23, %s1125_s23 }
  0x2a   :  { %832 = vmatpush3.msra.mxu0 %v94_v1  ;;  %v69_v9 = vmul.f32 %v708_v6, %v60_v5  ;;  %864 = vmatprep.subr.mxu1 %v196_v8  ;;  %v90_v11 = vld [vmem:[#allocation7 + $0x50] sm:$0xff]  ;;  %v194_v13 = vld [vmem:[#allocation7 + $0xe8] sm:$0xff]  ;;  %v88_v16 = vld [vmem:[#allocation7 + $0x40] sm:$0xff] }
  0x2b   :  { %833 = vmatprep.subr.mxu0 %v93_v2  ;;  %865 = vmatpush3.msra.mxu1 %v196_v8  ;;  %v89_v14 = vld [vmem:[#allocation7 + $0x48] sm:$0xff]  ;;  %v192_v17 = vld [vmem:[#allocation7 + $0xd8] sm:$0xff]  ;;  %v191_v19 = vld [vmem:[#allocation7 + $0xd0] sm:$0xff]  ;;  %p1132_p4 = por %p1131_p3, %p1130_p2 }
  0x2c   :  { %834 = vmatpush3.msra.mxu0 %v93_v2  ;;  %v78_v12 = vadd.f32 %v709_v7, %v69_v9  ;;  %866 = vmatprep.subr.mxu1 %v195_v10  ;;  %v87_v18 = vld [vmem:[#allocation7 + $0x38] sm:$0xff]  ;;  %v86_v20 = vld [vmem:[#allocation7 + $0x30] sm:$0xff]  ;;  %v85_v21 = vld [vmem:[#allocation7 + $0x28] sm:$0xff] }
  0x2d   :  { %835 = vmatprep.subr.mxu0 %v92_v3  ;;  %867 = vmatpush3.msra.mxu1 %v195_v10  ;;  %v84_v22 = vld [vmem:[#allocation7 + $0x20] sm:$0xff]  ;;  %v83_v23 = vld [vmem:[#allocation7 + $0x18] sm:$0xff]  ;;  %v82_v25 = vld [vmem:[#allocation7 + $0x10] sm:$0xff]  ;;  %p1133_p5 = pnand %p1132_p4, %p1126_p1 }
  0x2e   :  { %836 = vmatpush3.msra.mxu0 %v92_v3  ;;  %861 = vmatprep.mubr.f32.mxu0 %v78_v12  ;;  %v61_v24 = vld [vmem:[#allocation2 + $0x8] sm:$0xff]  ;;  %v81_v27 = vld [vmem:[#allocation7 + $0x8] sm:$0xff]  ;;  %v80_v28 = vld [vmem:[#allocation7] sm:$0xff] }
  0x2f   :  { %837 = vmatprep.subr.mxu0 %v91_v4  ;;  %868 = vmatprep.subr.mxu1 %v194_v13  ;;  %v70_v26 = vmul.f32 %v708_v6, %v61_v24  ;;  %v190_v30 = vld [vmem:[#allocation7 + $0xc8] sm:$0xff]  ;;  %v189_v31 = vld [vmem:[#allocation7 + $0xc0] sm:$0xff]  ;;  %v188_v32 = vld [vmem:[#allocation7 + $0xb8] sm:$0xff] }
  0x30   :  { %838 = vmatpush3.msra.mxu0 %v91_v4  ;;  %869 = vmatpush3.msra.mxu1 %v194_v13  ;;  %v187_v33 = vld [vmem:[#allocation7 + $0xb0] sm:$0xff]  ;;  %v186_v34 = vld [vmem:[#allocation7 + $0xa8] sm:$0xff]  ;;  %v185_v35 = vld [vmem:[#allocation7 + $0xa0] sm:$0xff] }
  0x31   :  { %839 = vmatprep.subr.mxu0 %v90_v11  ;;  %870 = vmatprep.subr.mxu1 %v193_v15  ;;  %v79_v29 = vadd.f32 %v709_v7, %v70_v26  ;;  %v184_v36 = vld [vmem:[#allocation7 + $0x98] sm:$0xff]  ;;  %v183_v37 = vld [vmem:[#allocation7 + $0x90] sm:$0xff]  ;;  %v182_v38 = vld [vmem:[#allocation7 + $0x88] sm:$0xff] }
  0x32   :  { %840 = vmatpush3.msra.mxu0 %v90_v11  ;;  %871 = vmatpush3.msra.mxu1 %v193_v15  ;;  %v181_v39 = vld [vmem:[#allocation7 + $0x80] sm:$0xff]  ;;  %v298_v40 = vld [vmem:[#allocation7 + $0x178] sm:$0xff]  ;;  %v297_v41 = vld [vmem:[#allocation7 + $0x170] sm:$0xff] }
  0x33   :  { %841 = vmatprep.subr.mxu0 %v89_v14  ;;  %872 = vmatprep.subr.mxu1 %v192_v17  ;;  %v296_v42 = vld [vmem:[#allocation7 + $0x168] sm:$0xff]  ;;  %v295_v43 = vld [vmem:[#allocation7 + $0x160] sm:$0xff]  ;;  %v294_v44 = vld [vmem:[#allocation7 + $0x158] sm:$0xff] }
  0x34   :  { %842 = vmatpush3.msra.mxu0 %v89_v14  ;;  %873 = vmatpush3.msra.mxu1 %v192_v17  ;;  %v293_v45 = vld [vmem:[#allocation7 + $0x150] sm:$0xff]  ;;  %v710_v46 = vld [vmem:[%s1233_s4] ss:$0 sm:$0xff]  ;;  %v291_v54 = vld [vmem:[#allocation7 + $0x140] sm:$0xff] }
  0x35   :  { %843 = vmatprep.subr.mxu0 %v88_v16  ;;  %874 = vmatprep.subr.mxu1 %v191_v19  ;;  %v292_v53 = vld [vmem:[#allocation7 + $0x148] sm:$0xff]  ;;  %v290_v55 = vld [vmem:[#allocation7 + $0x138] sm:$0xff]  ;;  %v289_v56 = vld [vmem:[#allocation7 + $0x130] sm:$0xff] }
  0x36   :  { %844 = vmatpush3.msra.mxu0 %v88_v16  ;;  %875 = vmatpush3.msra.mxu1 %v191_v19  ;;  %v288_v57 = vld [vmem:[#allocation7 + $0x128] sm:$0xff]  ;;  %v287_v58 = vld [vmem:[#allocation7 + $0x120] sm:$0xff]  ;;  %v286_v59 = vld [vmem:[#allocation7 + $0x118] sm:$0xff] }
  0x37   :  { %845 = vmatprep.subr.mxu0 %v87_v18  ;;  %876 = vmatprep.subr.mxu1 %v190_v30  ;;  %v285_v60 = vld [vmem:[#allocation7 + $0x110] sm:$0xff]  ;;  %v284_v61 = vld [vmem:[#allocation7 + $0x108] sm:$0xff]  ;;  %v283_v62 = vld [vmem:[#allocation7 + $0x100] sm:$0xff] }
  0x38   :  { %846 = vmatpush3.msra.mxu0 %v87_v18  ;;  %877 = vmatpush3.msra.mxu1 %v190_v30  ;;  %v400_v63 = vld [vmem:[#allocation7 + $0x1f8] sm:$0xff]  ;;  %v399_v0 = vld [vmem:[#allocation7 + $0x1f0] sm:$0xff]  ;;  %v398_v1 = vld [vmem:[#allocation7 + $0x1e8] sm:$0xff] }
  0x39   :  { %847 = vmatprep.subr.mxu0 %v86_v20  ;;  %878 = vmatprep.subr.mxu1 %v189_v31  ;;  %v397_v2 = vld [vmem:[#allocation7 + $0x1e0] sm:$0xff]  ;;  %v396_v3 = vld [vmem:[#allocation7 + $0x1d8] sm:$0xff]  ;;  %v395_v4 = vld [vmem:[#allocation7 + $0x1d0] sm:$0xff] }
  0x3a   :  { %848 = vmatpush3.msra.mxu0 %v86_v20  ;;  %879 = vmatpush3.msra.mxu1 %v189_v31  ;;  %v712_v5 = vld [vmem:[%s1233_s4 + $0x1] ss:$0 sm:$0xff]  ;;  %v393_v13 = vld [vmem:[#allocation7 + $0x1c0] sm:$0xff]  ;;  %v392_v14 = vld [vmem:[#allocation7 + $0x1b8] sm:$0xff] }
  0x3b   :  { %849 = vmatprep.subr.mxu0 %v85_v21  ;;  %880 = vmatprep.subr.mxu1 %v188_v32  ;;  %v394_v12 = vld [vmem:[#allocation7 + $0x1c8] sm:$0xff]  ;;  %v391_v15 = vld [vmem:[#allocation7 + $0x1b0] sm:$0xff]  ;;  %v389_v17 = vld [vmem:[#allocation7 + $0x1a0] sm:$0xff] }
  0x3c   :  { %850 = vmatpush3.msra.mxu0 %v85_v21  ;;  %881 = vmatpush3.msra.mxu1 %v188_v32  ;;  %v390_v16 = vld [vmem:[#allocation7 + $0x1a8] sm:$0xff]  ;;  %v388_v18 = vld [vmem:[#allocation7 + $0x198] sm:$0xff]  ;;  %v387_v19 = vld [vmem:[#allocation7 + $0x190] sm:$0xff] }
  0x3d   :  { %851 = vmatprep.subr.mxu0 %v84_v22  ;;  %882 = vmatprep.subr.mxu1 %v187_v33  ;;  %v386_v20 = vld [vmem:[#allocation7 + $0x188] sm:$0xff]  ;;  %v385_v21 = vld [vmem:[#allocation7 + $0x180] sm:$0xff]  ;;  %v498_v26 = vld [vmem:[#allocation7 + $0x258] sm:$0xff] }
  0x3e   :  { %852 = vmatpush3.msra.mxu0 %v84_v22  ;;  %883 = vmatpush3.msra.mxu1 %v187_v33  ;;  %v502_v22 = vld [vmem:[#allocation7 + $0x278] sm:$0xff]  ;;  %v500_v24 = vld [vmem:[#allocation7 + $0x268] sm:$0xff] }
  0x3f   :  { %853 = vmatprep.subr.mxu0 %v83_v23  ;;  %884 = vmatprep.subr.mxu1 %v186_v34 }
  0x40   :  { %854 = vmatpush3.msra.mxu0 %v83_v23  ;;  %885 = vmatpush3.msra.mxu1 %v186_v34  ;;  %v501_v23 = vld [vmem:[#allocation7 + $0x270] sm:$0xff] }
  0x41   :  { %855 = vmatprep.subr.mxu0 %v82_v25  ;;  %886 = vmatprep.subr.mxu1 %v185_v35 }
  0x42   :  { %856 = vmatpush3.msra.mxu0 %v82_v25  ;;  %887 = vmatpush3.msra.mxu1 %v185_v35  ;;  %v499_v25 = vld [vmem:[#allocation7 + $0x260] sm:$0xff]  ;;  %v496_v35 = vld [vmem:[#allocation7 + $0x248] sm:$0xff] }
  0x43   :  { %857 = vmatprep.subr.mxu0 %v81_v27  ;;  %888 = vmatprep.subr.mxu1 %v184_v36 }
  0x44   :  { %858 = vmatpush3.msra.mxu0 %v81_v27  ;;  %889 = vmatpush3.msra.mxu1 %v184_v36  ;;  %v497_v27 = vld [vmem:[#allocation7 + $0x250] sm:$0xff]  ;;  %v495_v36 = vld [vmem:[#allocation7 + $0x240] sm:$0xff] }
  0x45   :  { %859 = vmatprep.subr.mxu0 %v80_v28  ;;  %890 = vmatprep.subr.mxu1 %v183_v37 }
  0x46   :  { %860 = vmatpush3.msra.mxu0 %v80_v28  ;;  %891 = vmatpush3.msra.mxu1 %v183_v37  ;;  %v714_v28 = vld [vmem:[%s1233_s4 + $0x2] ss:$0 sm:$0xff]  ;;  %v494_v37 = vld [vmem:[#allocation7 + $0x238] sm:$0xff] }
  0x47   :  { %862 = vmatmul.mubr.f32.vlgmr.msra.gmra.mxu0 %v79_v29  ;;  %892 = vmatprep.subr.mxu1 %v182_v38 }
  0x48   :  { %893 = vmatpush3.msra.mxu1 %v182_v38  ;;  %899 = vmatprep.subr.mxu0 %v298_v40  ;;  %v493_v38 = vld [vmem:[#allocation7 + $0x230] sm:$0xff] }
  0x49   :  { %894 = vmatprep.subr.mxu1 %v181_v39  ;;  %900 = vmatpush3.msra.mxu0 %v298_v40  ;;  %v491_v40 = vld [vmem:[#allocation7 + $0x220] sm:$0xff] }
  0x4a   :  { %895 = vmatpush3.msra.mxu1 %v181_v39  ;;  %901 = vmatprep.subr.mxu0 %v297_v41  ;;  %v492_v39 = vld [vmem:[#allocation7 + $0x228] sm:$0xff] }
  0x4b   :  { %902 = vmatpush3.msra.mxu0 %v297_v41  ;;  %934 = vmatprep.subr.mxu1 %v400_v63  ;;  %v490_v41 = vld [vmem:[#allocation7 + $0x218] sm:$0xff] }
  0x4c   :  { %903 = vmatprep.subr.mxu0 %v296_v42 }
  0x4d   :  { %904 = vmatpush3.msra.mxu0 %v296_v42  ;;  %v489_v42 = vld [vmem:[#allocation7 + $0x210] sm:$0xff] }
  0x4e   :  { %905 = vmatprep.subr.mxu0 %v295_v43 }
  0x4f   :  { %906 = vmatpush3.msra.mxu0 %v295_v43  ;;  %v488_v43 = vld [vmem:[#allocation7 + $0x208] sm:$0xff] }
  0x50   :  { %907 = vmatprep.subr.mxu0 %v294_v44 }
  0x51   :  { %908 = vmatpush3.msra.mxu0 %v294_v44  ;;  %v487_v44 = vld [vmem:[#allocation7 + $0x200] sm:$0xff] }
  0x52   :  { %909 = vmatprep.subr.mxu0 %v293_v45 }
  0x53   :  { %910 = vmatpush3.msra.mxu0 %v293_v45  ;;  %v604_v45 = vld [vmem:[#allocation7 + $0x2f8] sm:$0xff] }
  0x54   :  { %911 = vmatprep.subr.mxu0 %v292_v53 }
  0x55   :  { %912 = vmatpush3.msra.mxu0 %v292_v53 }
  0x56   :  { %913 = vmatprep.subr.mxu0 %v291_v54 }
  0x57   :  { %914 = vmatpush3.msra.mxu0 %v291_v54 }
  0x58   :  { %915 = vmatprep.subr.mxu0 %v290_v55 }
  0x59   :  { %916 = vmatpush3.msra.mxu0 %v290_v55 }
  0x5a   :  { %917 = vmatprep.subr.mxu0 %v289_v56 }
  0x5b   :  { %918 = vmatpush3.msra.mxu0 %v289_v56 }
  0x5c   :  { %919 = vmatprep.subr.mxu0 %v288_v57 }
  0x5d   :  { %920 = vmatpush3.msra.mxu0 %v288_v57 }
  0x5e   :  { %921 = vmatprep.subr.mxu0 %v287_v58 }
  0x5f   :  { %922 = vmatpush3.msra.mxu0 %v287_v58  ;;  %v598_v58 = vld [vmem:[#allocation7 + $0x2c8] sm:$0xff] }
  0x60   :  { %923 = vmatprep.subr.mxu0 %v286_v59 }
  0x61   :  { %924 = vmatpush3.msra.mxu0 %v286_v59  ;;  %v597_v59 = vld [vmem:[#allocation7 + $0x2c0] sm:$0xff] }
  0x62   :  { %925 = vmatprep.subr.mxu0 %v285_v60 }
  0x63   :  { %926 = vmatpush3.msra.mxu0 %v285_v60  ;;  %v596_v60 = vld [vmem:[#allocation7 + $0x2b8] sm:$0xff] }
  0x64   :  { %927 = vmatprep.subr.mxu0 %v284_v61 }
  0x65   :  { %928 = vmatpush3.msra.mxu0 %v284_v61  ;;  %v595_v61 = vld [vmem:[#allocation7 + $0x2b0] sm:$0xff] }
  0x66   :  { %929 = vmatprep.subr.mxu0 %v283_v62 }
  0x67   :  { %930 = vmatpush3.msra.mxu0 %v283_v62  ;;  %v594_v62 = vld [vmem:[#allocation7 + $0x2a8] sm:$0xff] }
  0x68   :  { %969 = vmatprep.subr.mxu0 %v502_v22 }
 0x107   :  { %v863_v47 = vpop.f32.mrf.mxu0 }
 0x108   :  { %v175_v48 = vadd.f32 %v863_v47, %v710_v46  ;;  %v602_v47 = vld [vmem:[#allocation7 + $0x2e8] sm:$0xff] }
 0x109   :  { %v169_v49 = vpop.f32.mrf.mxu0 }
 0x10a   :  { %v170_v50 = vadd.f32 %v710_v46, %v169_v49  ;;  %v603_v46 = vld [vmem:[#allocation7 + $0x2f0] sm:$0xff]  ;;  %v600_v49 = vld [vmem:[#allocation7 + $0x2d8] sm:$0xff] }
 0x10c   :  { %1045 = vtanh.f32 %v170_v50  ;;  %v599_v50 = vld [vmem:[#allocation7 + $0x2d0] sm:$0xff] }
 0x10d   :  { %1047 = vtanh.f32 %v175_v48  ;;  %v601_v48 = vld [vmem:[#allocation7 + $0x2e0] sm:$0xff] }
 0x119   :  { %v1046_v51 = vpop.eup %1045 }
 0x11a   :  { %v1048_v52 = vpop.eup %1047  ;;  %896 = vmatprep.mubr.f32.mxu1 %v1046_v51  ;;  %v716_v51 = vld [vmem:[%s1233_s4 + $0x3] ss:$0 sm:$0xff] }
 0x11b   :  { %897 = vmatmul.mubr.f32.vlgmr.msra.gmra.mxu1 %v1048_v52 }
 0x11c   :  { %935 = vmatpush3.msra.mxu1 %v400_v63  ;;  %v593_v63 = vld [vmem:[#allocation7 + $0x2a0] sm:$0xff] }
 0x11d   :  { %936 = vmatprep.subr.mxu1 %v399_v0 }
 0x11e   :  { %937 = vmatpush3.msra.mxu1 %v399_v0  ;;  %v592_v0 = vld [vmem:[#allocation7 + $0x298] sm:$0xff] }
 0x11f   :  { %938 = vmatprep.subr.mxu1 %v398_v1 }
 0x120   :  { %939 = vmatpush3.msra.mxu1 %v398_v1  ;;  %v591_v1 = vld [vmem:[#allocation7 + $0x290] sm:$0xff] }
 0x121   :  { %940 = vmatprep.subr.mxu1 %v397_v2 }
 0x122   :  { %941 = vmatpush3.msra.mxu1 %v397_v2  ;;  %v590_v2 = vld [vmem:[#allocation7 + $0x288] sm:$0xff] }
 0x123   :  { %942 = vmatprep.subr.mxu1 %v396_v3 }
 0x124   :  { %943 = vmatpush3.msra.mxu1 %v396_v3  ;;  %v589_v3 = vld [vmem:[#allocation7 + $0x280] sm:$0xff] }
 0x125   :  { %944 = vmatprep.subr.mxu1 %v395_v4 }
 0x126   :  { %945 = vmatpush3.msra.mxu1 %v395_v4  ;;  %v718_v4 = vld [vmem:[%s1233_s4 + $0x4] ss:$0 sm:$0xff] }
 0x127   :  { %946 = vmatprep.subr.mxu1 %v394_v12 }
 0x128   :  { %947 = vmatpush3.msra.mxu1 %v394_v12 }
 0x129   :  { %948 = vmatprep.subr.mxu1 %v393_v13 }
 0x12a   :  { %949 = vmatpush3.msra.mxu1 %v393_v13 }
 0x12b   :  { %950 = vmatprep.subr.mxu1 %v392_v14 }
 0x12c   :  { %951 = vmatpush3.msra.mxu1 %v392_v14 }
 0x12d   :  { %952 = vmatprep.subr.mxu1 %v391_v15 }
 0x12e   :  { %953 = vmatpush3.msra.mxu1 %v391_v15 }
 0x12f   :  { %954 = vmatprep.subr.mxu1 %v390_v16 }
 0x130   :  { %955 = vmatpush3.msra.mxu1 %v390_v16 }
 0x131   :  { %956 = vmatprep.subr.mxu1 %v389_v17 }
 0x132   :  { %957 = vmatpush3.msra.mxu1 %v389_v17 }
 0x133   :  { %958 = vmatprep.subr.mxu1 %v388_v18 }
 0x134   :  { %959 = vmatpush3.msra.mxu1 %v388_v18 }
 0x135   :  { %960 = vmatprep.subr.mxu1 %v387_v19 }
 0x136   :  { %961 = vmatpush3.msra.mxu1 %v387_v19 }
 0x137   :  { %962 = vmatprep.subr.mxu1 %v386_v20 }
 0x138   :  { %963 = vmatpush3.msra.mxu1 %v386_v20 }
 0x139   :  { %964 = vmatprep.subr.mxu1 %v385_v21 }
 0x13a   :  { %965 = vmatpush3.msra.mxu1 %v385_v21 }
 0x13b   :  { %1004 = vmatprep.subr.mxu1 %v604_v45 }
 0x1db   :  { %v898_v6 = vpop.f32.mrf.mxu1 }
 0x1dc   :  { %v277_v7 = vadd.f32 %v898_v6, %v712_v5 }
 0x1dd   :  { %v271_v8 = vpop.f32.mrf.mxu1 }
 0x1de   :  { %v272_v9 = vadd.f32 %v712_v5, %v271_v8 }
 0x1e0   :  { %1049 = vtanh.f32 %v272_v9 }
 0x1e1   :  { %1051 = vtanh.f32 %v277_v7 }
 0x1ed   :  { %v1050_v10 = vpop.eup %1049 }
 0x1ee   :  { %v1052_v11 = vpop.eup %1051  ;;  %931 = vmatprep.mubr.f32.mxu0 %v1050_v10 }
 0x1ef   :  { %932 = vmatmul.mubr.f32.vlgmr.msra.gmra.mxu0 %v1052_v11  ;;  %v720_v11 = vld [vmem:[%s1233_s4 + $0x5] ss:$0 sm:$0xff] }
 0x1f0   :  { %970 = vmatpush3.msra.mxu0 %v502_v22 }
 0x1f1   :  { %971 = vmatprep.subr.mxu0 %v501_v23 }
 0x1f2   :  { %972 = vmatpush3.msra.mxu0 %v501_v23 }
 0x1f3   :  { %973 = vmatprep.subr.mxu0 %v500_v24 }
 0x1f4   :  { %974 = vmatpush3.msra.mxu0 %v500_v24 }
 0x1f5   :  { %975 = vmatprep.subr.mxu0 %v499_v25 }
 0x1f6   :  { %976 = vmatpush3.msra.mxu0 %v499_v25 }
 0x1f7   :  { %977 = vmatprep.subr.mxu0 %v498_v26 }
 0x1f8   :  { %978 = vmatpush3.msra.mxu0 %v498_v26 }
 0x1f9   :  { %979 = vmatprep.subr.mxu0 %v497_v27 }
 0x1fa   :  { %980 = vmatpush3.msra.mxu0 %v497_v27 }
 0x1fb   :  { %981 = vmatprep.subr.mxu0 %v496_v35 }
 0x1fc   :  { %982 = vmatpush3.msra.mxu0 %v496_v35 }
 0x1fd   :  { %983 = vmatprep.subr.mxu0 %v495_v36 }
 0x1fe   :  { %984 = vmatpush3.msra.mxu0 %v495_v36 }
 0x1ff   :  { %985 = vmatprep.subr.mxu0 %v494_v37 }
 0x200   :  { %986 = vmatpush3.msra.mxu0 %v494_v37 }
 0x201   :  { %987 = vmatprep.subr.mxu0 %v493_v38 }
 0x202   :  { %988 = vmatpush3.msra.mxu0 %v493_v38 }
 0x203   :  { %989 = vmatprep.subr.mxu0 %v492_v39 }
 0x204   :  { %990 = vmatpush3.msra.mxu0 %v492_v39 }
 0x205   :  { %991 = vmatprep.subr.mxu0 %v491_v40 }
 0x206   :  { %992 = vmatpush3.msra.mxu0 %v491_v40 }
 0x207   :  { %993 = vmatprep.subr.mxu0 %v490_v41 }
 0x208   :  { %994 = vmatpush3.msra.mxu0 %v490_v41 }
 0x209   :  { %995 = vmatprep.subr.mxu0 %v489_v42 }
 0x20a   :  { %996 = vmatpush3.msra.mxu0 %v489_v42 }
 0x20b   :  { %997 = vmatprep.subr.mxu0 %v488_v43 }
 0x20c   :  { %998 = vmatpush3.msra.mxu0 %v488_v43 }
 0x20d   :  { %999 = vmatprep.subr.mxu0 %v487_v44 }
 0x20e   :  { %1000 = vmatpush3.msra.mxu0 %v487_v44 }
 0x2af   :  { %v933_v29 = vpop.f32.mrf.mxu0 }
 0x2b0   :  { %v379_v30 = vadd.f32 %v933_v29, %v714_v28 }
 0x2b1   :  { %v373_v31 = vpop.f32.mrf.mxu0 }
 0x2b2   :  { %v374_v32 = vadd.f32 %v714_v28, %v373_v31 }
 0x2b4   :  { %1053 = vtanh.f32 %v374_v32 }
 0x2b5   :  { %1055 = vtanh.f32 %v379_v30 }
 0x2c1   :  { %v1054_v33 = vpop.eup %1053 }
 0x2c2   :  { %v1056_v34 = vpop.eup %1055  ;;  %966 = vmatprep.mubr.f32.mxu1 %v1054_v33 }
 0x2c3   :  { %967 = vmatmul.mubr.f32.vlgmr.msra.gmra.mxu1 %v1056_v34 }
 0x2c4   :  { %1005 = vmatpush3.msra.mxu1 %v604_v45 }
 0x2c5   :  { %1006 = vmatprep.subr.mxu1 %v603_v46 }
 0x2c6   :  { %1007 = vmatpush3.msra.mxu1 %v603_v46 }
 0x2c7   :  { %1008 = vmatprep.subr.mxu1 %v602_v47 }
 0x2c8   :  { %1009 = vmatpush3.msra.mxu1 %v602_v47 }
 0x2c9   :  { %1010 = vmatprep.subr.mxu1 %v601_v48 }
 0x2ca   :  { %1011 = vmatpush3.msra.mxu1 %v601_v48 }
 0x2cb   :  { %1012 = vmatprep.subr.mxu1 %v600_v49 }
 0x2cc   :  { %1013 = vmatpush3.msra.mxu1 %v600_v49 }
 0x2cd   :  { %1014 = vmatprep.subr.mxu1 %v599_v50 }
 0x2ce   :  { %1015 = vmatpush3.msra.mxu1 %v599_v50 }
 0x2cf   :  { %1016 = vmatprep.subr.mxu1 %v598_v58 }
 0x2d0   :  { %1017 = vmatpush3.msra.mxu1 %v598_v58 }
 0x2d1   :  { %1018 = vmatprep.subr.mxu1 %v597_v59 }
 0x2d2   :  { %1019 = vmatpush3.msra.mxu1 %v597_v59 }
 0x2d3   :  { %1020 = vmatprep.subr.mxu1 %v596_v60 }
 0x2d4   :  { %1021 = vmatpush3.msra.mxu1 %v596_v60 }
 0x2d5   :  { %1022 = vmatprep.subr.mxu1 %v595_v61 }
 0x2d6   :  { %1023 = vmatpush3.msra.mxu1 %v595_v61 }
 0x2d7   :  { %1024 = vmatprep.subr.mxu1 %v594_v62 }
 0x2d8   :  { %1025 = vmatpush3.msra.mxu1 %v594_v62 }
 0x2d9   :  { %1026 = vmatprep.subr.mxu1 %v593_v63 }
 0x2da   :  { %1027 = vmatpush3.msra.mxu1 %v593_v63 }
 0x2db   :  { %1028 = vmatprep.subr.mxu1 %v592_v0 }
 0x2dc   :  { %1029 = vmatpush3.msra.mxu1 %v592_v0 }
 0x2dd   :  { %1030 = vmatprep.subr.mxu1 %v591_v1 }
 0x2de   :  { %1031 = vmatpush3.msra.mxu1 %v591_v1 }
 0x2df   :  { %1032 = vmatprep.subr.mxu1 %v590_v2 }
 0x2e0   :  { %1033 = vmatpush3.msra.mxu1 %v590_v2 }
 0x2e1   :  { %1034 = vmatprep.subr.mxu1 %v589_v3 }
 0x2e2   :  { %1035 = vmatpush3.msra.mxu1 %v589_v3 }
 0x383   :  { %v968_v52 = vpop.f32.mrf.mxu1 }
 0x384   :  { %v481_v53 = vadd.f32 %v968_v52, %v716_v51 }
 0x385   :  { %v475_v54 = vpop.f32.mrf.mxu1 }
 0x386   :  { %v476_v55 = vadd.f32 %v716_v51, %v475_v54 }
 0x388   :  { %1057 = vtanh.f32 %v476_v55 }
 0x389   :  { %1059 = vtanh.f32 %v481_v53 }
 0x395   :  { %v1058_v56 = vpop.eup %1057 }
 0x396   :  { %v1060_v57 = vpop.eup %1059  ;;  %1001 = vmatprep.mubr.f32.mxu0 %v1058_v56 }
 0x397   :  { %1002 = vmatmul.mubr.f32.vlgmr.msra.gmra.mxu0 %v1060_v57 }
 0x457   :  { %v1003_v5 = vpop.f32.mrf.mxu0 }
 0x458   :  { %v583_v6 = vadd.f32 %v1003_v5, %v718_v4 }
 0x459   :  { %v577_v7 = vpop.f32.mrf.mxu0 }
 0x45a   :  { %v578_v8 = vadd.f32 %v718_v4, %v577_v7 }
 0x45c   :  { %1061 = vtanh.f32 %v578_v8 }
 0x45d   :  { %1063 = vtanh.f32 %v583_v6 }
 0x469   :  { %v1062_v9 = vpop.eup %1061 }
 0x46a   :  { %v1064_v10 = vpop.eup %1063  ;;  %1036 = vmatprep.mubr.f32.mxu1 %v1062_v9 }
 0x46b   :  { %1037 = vmatmul.mubr.f32.vlgmr.msra.gmra.mxu1 %v1064_v10 }
 0x52b   :  { %v1038_v12 = vpop.f32.mrf.mxu1 }
 0x52c   :  { %v685_v13 = vadd.f32 %v1038_v12, %v720_v11 }
 0x52d   :  { %v679_v14 = vpop.f32.mrf.mxu1 }
 0x52e   :  { %689 = vst [vmem:[#allocation8 + $0x8] sm:$0xff] %v685_v13  ;;  %v680_v15 = vadd.f32 %v720_v11, %v679_v14 }
 0x530   :  { %688 = vst [vmem:[#allocation8] sm:$0xff] %v680_v15 }
 0x531   :  { %1136 = shalt.err (!%p1133_p5)
}
 0x532   :  { %701 = dma.vmem_to_hbm [thread:$0]  %s696_s22, 256, %s1234_s5, [#allocation4], %s1153_s27, %s1153_s27, %s1154_s28  }
 0x533   :  { %1149 = dma.done.wait [#allocation4], 256  }
 0x534   :  { %1150 = vsyncadd [#allocation4], 4294967040 }
 0x535   :  { %705 = vsyncpa [#allocation3], 1 }
 0x536   :  { %706 = vsyncpa [#allocation6], 1 }
 0x537   :  { %707 = vsyncpa [#allocation4], 1 }

</bundles_post_ra>
